<compile_context>
chip_gen: v7x
topology: tpu7x:2x2x1
jax: 0.10.0
libtpu: 0.0.40
codegen_flags: <defaults>
</compile_context>

<pallas_src>
import functools

import numpy as np
import jax
import jax.numpy as jnp
from jax.experimental import pallas as pl
from jax.experimental.pallas import tpu as pltpu

EPS = 1e-5
_OFFSETS = tuple((oy, ox) for oy in (-1, 0, 1) for ox in (-1, 0, 1))


# ----------------------------------------------------------------------------
# Fused kernel: conv1(1x1) -> gconv(3x3) -> conv3(1x1), each + folded BN + ReLU
# ----------------------------------------------------------------------------
def _group_block_kernel(xt_ref, xc_ref, xb_ref, lr_ref,
                        w1_ref, b1_ref, w2_ref, b2_ref, w3_ref, b3_ref,
                        o_ref, *, img_w, use_im2col):
    t = pl.program_id(1)               # row-band index
    n_t = pl.num_programs(1)
    p = xc_ref.shape[2]                # flattened pixels per band (TH * W), lane-dense
    w = img_w
    wn = p + 4 * w                     # window = [2 halo rows | band | 2 halo rows]
    ch = w2_ref.shape[0]               # padded hidden channels

    # Window for the 3x3 conv.  Only the inner halo row on each side carries
    # data that is read at unmasked positions; the outer row merely keeps all
    # nine tap slices statically in-bounds.  (concat in f32, single bf16 cast —
    # negligible vs. the matmuls at these Cin and the most robust lowering.)
    window = jnp.concatenate([xt_ref[0, 0], xc_ref[0], xb_ref[0, 0]], axis=1)
    window = window.astype(jnp.bfloat16)                                   # (Cin, Wn)

    # ---- stage 1: 1x1 conv (BN scale pre-folded into weights) + bias + ReLU ----
    h1 = jnp.dot(w1_ref[...], window, preferred_element_type=jnp.float32)  # (Ch, Wn)
    h1 = jnp.maximum(h1 + b1_ref[...], 0.0)

    # Top/bottom image-boundary kill: zero the halo regions of h1 when this band
    # touches the first / last image row (ONE full-width multiply, replaces the
    # previous six per-tap selects).
    pos = jax.lax.broadcasted_iota(jnp.int32, (1, wn), 1)
    tb_ok = jnp.logical_and(jnp.logical_or(pos >= 2 * w, t != 0),
                            jnp.logical_or(pos < 2 * w + p, t != n_t - 1))
    h1 = h1 * tb_ok.astype(jnp.float32)

    # Left/right masks, applied once per horizontal tap direction (window-space
    # tables precomputed in the wrapper: row 0 kills col==W-1 -> ox=-1 taps,
    # row 1 kills col==0 -> ox=+1 taps).
    h1_l = h1 * lr_ref[0:1, :]
    h1_r = h1 * lr_ref[1:2, :]
    srcs = {-1: h1_l, 0: h1, 1: h1_r}

    # ---- stage 2: 3x3 "same" conv ----
    def tap(oy, ox):
        s = 2 * w + oy * w + ox        # static; always within [W-1, 3W+1] >= 0
        return srcs[ox][:, s:s + p].astype(jnp.bfloat16)                   # (Ch, P)

    if use_im2col:
        # Small Ch: one K = 9*Ch matmul fills the MXU better.  Taps are bf16 and
        # Ch is padded to 16, so the sublane concat is tile-aligned.
        him = jnp.concatenate([tap(oy, ox) for oy, ox in _OFFSETS], axis=0)  # (9Ch, P)
        h2 = jnp.dot(w2_ref[...], him, preferred_element_type=jnp.float32)
    else:
        # Ch at/above MXU width: nine accumulating K = Ch matmuls, no (9Ch, P)
        # materialization (VMEM / vst relief, important on v7x's 64 MiB VMEM).
        h2 = jnp.zeros((ch, p), jnp.float32)
        for k, (oy, ox) in enumerate(_OFFSETS):
            h2 = h2 + jnp.dot(w2_ref[:, k * ch:(k + 1) * ch], tap(oy, ox),
                              preferred_element_type=jnp.float32)
    h2 = jnp.maximum(h2 + b2_ref[...], 0.0).astype(jnp.bfloat16)           # (Ch, P)

    # ---- stage 3: 1x1 conv + bias + ReLU ----
    y = jnp.dot(w3_ref[...], h2, preferred_element_type=jnp.float32)       # (Cout, P)
    y = jnp.maximum(y + b3_ref[...], 0.0)
    o_ref[0] = y.astype(o_ref.dtype)                                       # lane-dense store


# ----------------------------------------------------------------------------
# VMEM-aware tile selection
# ----------------------------------------------------------------------------
def _vmem_capacity_bytes():
    try:
        info = pltpu.get_tpu_info()
        for name in ("vmem_capacity_bytes", "vmem_bytes", "vmem_size_bytes"):
            v = getattr(info, name, None)
            if v:
                return int(v)
    except Exception:
        pass
    return 64 * 1024 * 1024            # conservative (v7x-sized) fallback


def _estimate_vmem_bytes(th, W, cin, ch, cout, use_im2col):
    p = th * W
    wn = p + 4 * W
    f32, bf16 = 4, 2
    io = 2 * (cin * p * f32 + 2 * (cin * 2 * W * f32) + cout * p * f32)    # dbl-buffered blocks
    wgt = 2 * ((ch * cin + 9 * ch * ch + cout * ch) * bf16
               + (2 * ch + cout) * f32 + 2 * wn * f32)                     # weights/bias/masks
    tmp = (cin * wn * (f32 + bf16)          # window (f32 pieces + bf16 copy)
           + 3 * ch * wn * f32              # h1, h1_l, h1_r
           + ch * p * (f32 + bf16)          # h2 f32 + bf16
           + cout * p * f32)                # y
    tmp += (9 * ch * p * bf16 + ch * p * bf16) if use_im2col else 2 * ch * p * bf16
    return io + wgt + tmp


def _choose_block_h(H, W, cin, ch, cout, use_im2col, budget_bytes, prefer_split):
    valid = [th for th in range(H, 0, -1)
             if H % th == 0 and (th == H or (th * W) % 128 == 0)]          # never empty (th=H)
    fits = [th for th in valid
            if _estimate_vmem_bytes(th, W, cin, ch, cout, use_im2col) <= budget_bytes]
    cands = fits if fits else [valid[-1]]
    if prefer_split:                        # expose >= 2 parallel blocks (v7x: 2 TCs)
        split = [th for th in cands if H // th >= 2]
        if split:
            return split[0]
    return cands[0]


# ----------------------------------------------------------------------------
# GroupBlock forward (fused Pallas kernel). Input/output: NCHW, like PyTorch.
# ----------------------------------------------------------------------------
def group_block_forward(x_nchw, params, block_h=None, nine_dot_min_hidden=128):
    B, Cin, H, W = x_nchw.shape
    w1h, s1, b1 = params["conv1"]          # (1,1,Cin,Ch)  HWIO, f32
    w2h, s2, b2 = params["gconv"]          # (3,3,Ch,Ch)
    w3h, s3, b3 = params["conv3"]          # (1,1,Ch,Cout)
    Ch = w1h.shape[3]
    Cout = w3h.shape[3]
    Chp = -(-Ch // 16) * 16                # hidden channels padded to bf16 sublane tile

    # Fold BN scale into the conv weights in f32, pad hidden channels with zeros,
    # then round to bf16 ONCE.  Bias (= scale*(conv_b - mean) + beta) stays f32.
    w1f = w1h[0, 0] * s1[None, :]                              # (Cin, Ch)
    w2f = w2h * s2[None, None, None, :]                        # (3,3,Ch,Ch)
    w3f = w3h[0, 0] * s3[None, :]                              # (Ch, Cout)
    ph = Chp - Ch
    w1m = jnp.transpose(jnp.pad(w1f, ((0, 0), (0, ph)))).astype(jnp.bfloat16)      # (Chp, Cin)
    w2m = jnp.transpose(jnp.pad(w2f, ((0, 0), (0, 0), (0, ph), (0, ph))),
                        (3, 0, 1, 2)).reshape(Chp, 9 * Chp).astype(jnp.bfloat16)
    w3m = jnp.transpose(jnp.pad(w3f, ((0, ph), (0, 0)))).astype(jnp.bfloat16)      # (Cout, Chp)
    b1p = jnp.pad(b1, ((0, ph),)).reshape(Chp, 1)
    b2p = jnp.pad(b2, ((0, ph),)).reshape(Chp, 1)
    b3c = b3.reshape(Cout, 1)

    use_im2col = Chp < nine_dot_min_hidden   # below MXU K-width, im2col fills the MXU

    vmem_total = _vmem_capacity_bytes()                       # 128 MiB v5e/v6e, 64 MiB v7x
    vmem_limit = min(vmem_total * 3 // 4, 100 * 1024 * 1024)  # headroom for the compiler
    budget = int(vmem_limit * 0.6)
    if block_h is None:
        TH = _choose_block_h(H, W, Cin, Chp, Cout, use_im2col, budget,
                             prefer_split=(B == 1 and H > 1))
    else:
        TH = block_h
    if H % TH != 0 or not (TH == H or (TH * W) % 128 == 0):
        raise ValueError(f"invalid block_h={TH} for H={H}, W={W}")
    nT = H // TH
    P = TH * W
    Wn = P + 4 * W

    # Flatten H,W (free, contiguous) so blocks are lane-dense; no transposes of x.
    x_flat = x_nchw.reshape(B, Cin, H * W)

    # Two-row halo strips per band: rows [t*TH-2, t*TH-1] above and
    # [(t+1)*TH, (t+1)*TH+1] below (clamped; boundary values are masked
    # in-kernel).  Tiny vs. re-fetching whole neighbour bands.
    tidx = np.arange(nT)
    top_rows = np.stack([np.clip(tidx * TH - 2, 0, H - 1),
                         np.clip(tidx * TH - 1, 0, H - 1)], axis=1).reshape(-1)
    bot_rows = np.stack([np.clip((tidx + 1) * TH, 0, H - 1),
                         np.clip((tidx + 1) * TH + 1, 0, H - 1)], axis=1).reshape(-1)

    def halo(rows):
        h = jnp.take(x_nchw, jnp.asarray(rows, dtype=jnp.int32), axis=2)   # (B,Cin,2nT,W)
        h = h.reshape(B, Cin, nT, 2 * W)
        return jnp.transpose(h, (0, 2, 1, 3))                              # (B,nT,Cin,2W)

    halo_top = halo(top_rows)
    halo_bot = halo(bot_rows)

    # Window-space left/right validity table (row 0: col != W-1, row 1: col != 0).
    win_col = np.arange(Wn) % W
    lrmask = jnp.asarray(np.stack([(win_col != W - 1),
                                   (win_col != 0)]).astype(np.float32))    # (2, Wn)

    rep2 = lambda b, t: (0, 0)
    out = pl.pallas_call(
        functools.partial(_group_block_kernel, img_w=W, use_im2col=use_im2col),
        out_shape=jax.ShapeDtypeStruct((B, Cout, H * W), jnp.float32),
        grid=(B, nT),
        in_specs=[
            pl.BlockSpec((1, 1, Cin, 2 * W), lambda b, t: (b, t, 0, 0)),   # top halo rows
            pl.BlockSpec((1, Cin, P), lambda b, t: (b, 0, t)),             # current row band
            pl.BlockSpec((1, 1, Cin, 2 * W), lambda b, t: (b, t, 0, 0)),   # bottom halo rows
            pl.BlockSpec((2, Wn), rep2),                                   # left/right masks
            pl.BlockSpec((Chp, Cin), rep2),
            pl.BlockSpec((Chp, 1), rep2),
            pl.BlockSpec((Chp, 9 * Chp), rep2),
            pl.BlockSpec((Chp, 1), rep2),
            pl.BlockSpec((Cout, Chp), rep2),
            pl.BlockSpec((Cout, 1), rep2),
        ],
        out_specs=pl.BlockSpec((1, Cout, P), lambda b, t: (b, 0, t)),
        compiler_params=pltpu.CompilerParams(
            dimension_semantics=("parallel", "parallel"),   # shards across TCs on v7x
            vmem_limit_bytes=int(vmem_limit),
        ),
    )(halo_top, x_flat, halo_bot, lrmask, w1m, b1p, w2m, b2p, w3m, b3c)

    return out.reshape(B, Cout, H, W)


# ----------------------------------------------------------------------------
# Parameter construction (deterministic) and BN folding
# ----------------------------------------------------------------------------
def make_conv_bn_params(key, kh, kw, cin, cout):
    k1, k2, k3, k4 = jax.random.split(key, 4)
    fan_in = cin * kh * kw
    w = jax.random.normal(k1, (kh, kw, cin, cout), jnp.float32) / np.sqrt(fan_in)
    b_conv = 0.1 * jax.random.normal(k2, (cout,), jnp.float32)
    gamma = 1.0 + 0.1 * jax.random.normal(k3, (cout,), jnp.float32)
    beta = 0.1 * jax.random.normal(k4, (cout,), jnp.float32)
    run_mean = jnp.zeros((cout,), jnp.float32)   # BatchNorm2d eval-mode stats
    run_var = jnp.ones((cout,), jnp.float32)
    scale = gamma / jnp.sqrt(run_var + EPS)
    bias = scale * (b_conv - run_mean) + beta    # fold conv bias + BN shift
    return w, scale, bias


def init_group_block(key, in_c, hidden_c, out_c):
    k1, k2, k3 = jax.random.split(key, 3)
    return {
        "conv1": make_conv_bn_params(k1, 1, 1, in_c, hidden_c),
        "gconv": make_conv_bn_params(k2, 3, 3, hidden_c, hidden_c),
        "conv3": make_conv_bn_params(k3, 1, 1, hidden_c, out_c),
    }


# ----------------------------------------------------------------------------
# Pure-JAX reference (NCHW). Weights rounded to bf16 to mirror the kernel's
# bf16 MXU operands; accumulation/affine/ReLU stay f32.
# ----------------------------------------------------------------------------
def group_block_reference(x_nchw, params):
    x = x_nchw
    for name in ("conv1", "gconv", "conv3"):
        w, s, b = params[name]
        wq = w.astype(jnp.bfloat16).astype(jnp.float32)
        pad = "SAME" if w.shape[0] == 3 else "VALID"
        y = jax.lax.conv_general_dilated(
            x, wq, window_strides=(1, 1), padding=pad,
            dimension_numbers=("NCHW", "HWIO", "NCHW"))
        c = w.shape[3]
        x = jnp.maximum(y * s.reshape(1, c, 1, 1) + b.reshape(1, c, 1, 1), 0.0)
    return x


if __name__ == "__main__":
    B, in_c, hidden_c, out_c, H, W = 2, 4, 8, 4, 16, 16
    key = jax.random.PRNGKey(0)
    kx, kp = jax.random.split(key)
    x = jax.random.normal(kx, (B, in_c, H, W), jnp.float32)   # NCHW, like PyTorch
    params = init_group_block(kp, in_c, hidden_c, out_c)

    ref = jax.block_until_ready(group_block_reference(x, params))

    # (block_h, nine_dot_min_hidden): explicit 2-band grid (halo path, im2col),
    # auto-chosen tile, and the nine-accumulating-dot 3x3 path (forced).
    for bh, nd_min in ((8, 128), (None, 128), (8, 1)):
        out = jax.block_until_ready(
            group_block_forward(x, params, block_h=bh, nine_dot_min_hidden=nd_min))
        assert out.shape == (B, out_c, H, W), out.shape
        assert np.all(np.isfinite(np.asarray(out)))
        # Kernel rounds activations to bf16 before each MXU matmul (reference
        # rounds only the weights) -> slightly looser tolerance.
        assert np.allclose(np.asarray(out), np.asarray(ref), rtol=2e-2, atol=2e-2), (
            f"mismatch vs pure-JAX reference (block_h={bh}, nine_dot_min={nd_min})")

    print("KERNEL_OK")
</pallas_src>

<mosaic_0001>
module attributes {stable_mosaic.version = 11 : i64} {
  func.func @_group_block_kernel(%arg0: i32, %arg1: i32, %arg2: memref<1x1x4x32xf32, #tpu.memory_space<vmem>>, %arg3: memref<1x4x128xf32, #tpu.memory_space<vmem>>, %arg4: memref<1x1x4x32xf32, #tpu.memory_space<vmem>>, %arg5: memref<2x192xf32, #tpu.memory_space<vmem>>, %arg6: memref<16x4xbf16, #tpu.memory_space<vmem>>, %arg7: memref<16x1xf32, #tpu.memory_space<vmem>>, %arg8: memref<16x144xbf16, #tpu.memory_space<vmem>>, %arg9: memref<16x1xf32, #tpu.memory_space<vmem>>, %arg10: memref<4x16xbf16, #tpu.memory_space<vmem>>, %arg11: memref<4x1xf32, #tpu.memory_space<vmem>>, %arg12: memref<1x4x128xf32, #tpu.memory_space<vmem>>) attributes {dimension_semantics = [#tpu.dimension_semantics<parallel>, #tpu.dimension_semantics<parallel>], iteration_bounds = array<i64: 2, 2>, scalar_prefetch = 0 : i64, scratch_operands = 0 : i64, tpu.core_type = #tpu.core_type<tc>, window_params = [{transform_indices = @transform_0, window_bounds = array<i64: 1, 1, 4, 32>}, {transform_indices = @transform_1, window_bounds = array<i64: 1, 4, 128>}, {transform_indices = @transform_2, window_bounds = array<i64: 1, 1, 4, 32>}, {pipeline_mode = #tpu.pipeline_mode<synchronous>, transform_indices = @transform_3, window_bounds = array<i64: 2, 192>}, {pipeline_mode = #tpu.pipeline_mode<synchronous>, transform_indices = @transform_4, window_bounds = array<i64: 16, 4>}, {pipeline_mode = #tpu.pipeline_mode<synchronous>, transform_indices = @transform_5, window_bounds = array<i64: 16, 1>}, {pipeline_mode = #tpu.pipeline_mode<synchronous>, transform_indices = @transform_6, window_bounds = array<i64: 16, 144>}, {pipeline_mode = #tpu.pipeline_mode<synchronous>, transform_indices = @transform_7, window_bounds = array<i64: 16, 1>}, {pipeline_mode = #tpu.pipeline_mode<synchronous>, transform_indices = @transform_8, window_bounds = array<i64: 4, 16>}, {pipeline_mode = #tpu.pipeline_mode<synchronous>, transform_indices = @transform_9, window_bounds = array<i64: 4, 1>}, {transform_indices = @transform_10, window_bounds = array<i64: 1, 4, 128>}]} {
    %c0 = arith.constant 0 : index
    %c0_0 = arith.constant 0 : index
    %c0_1 = arith.constant 0 : index
    %c0_2 = arith.constant 0 : index
    %0 = vector.load %arg2[%c0, %c0_0, %c0_1, %c0_2] : memref<1x1x4x32xf32, #tpu.memory_space<vmem>>, vector<1x1x4x32xf32>
    %1 = vector.shape_cast %0 : vector<1x1x4x32xf32> to vector<4x32xf32>
    %c0_3 = arith.constant 0 : index
    %c0_4 = arith.constant 0 : index
    %c0_5 = arith.constant 0 : index
    %2 = vector.load %arg3[%c0_3, %c0_4, %c0_5] : memref<1x4x128xf32, #tpu.memory_space<vmem>>, vector<1x4x128xf32>
    %3 = vector.shape_cast %2 : vector<1x4x128xf32> to vector<4x128xf32>
    %c0_6 = arith.constant 0 : index
    %c0_7 = arith.constant 0 : index
    %c0_8 = arith.constant 0 : index
    %c0_9 = arith.constant 0 : index
    %4 = vector.load %arg4[%c0_6, %c0_7, %c0_8, %c0_9] : memref<1x1x4x32xf32, #tpu.memory_space<vmem>>, vector<1x1x4x32xf32>
    %5 = vector.shape_cast %4 : vector<1x1x4x32xf32> to vector<4x32xf32>
    %6 = tpu.concatenate %1, %3, %5 in 1 : vector<4x32xf32>, vector<4x128xf32>, vector<4x32xf32> -> vector<4x192xf32>
    %7 = arith.truncf %6 : vector<4x192xf32> to vector<4x192xbf16>
    %c0_10 = arith.constant 0 : index
    %c0_11 = arith.constant 0 : index
    %8 = vector.load %arg6[%c0_10, %c0_11] : memref<16x4xbf16, #tpu.memory_space<vmem>>, vector<16x4xbf16>
    %cst = arith.constant dense<0.000000e+00> : vector<16x192xf32>
    %9 = tpu.matmul %8, %7, %cst {dimension_numbers = #tpu.dot_dimension_numbers<[1], [0], [0], [1], [0, 0, 1, 1], [], []>} : vector<16x4xbf16>, vector<4x192xbf16>, vector<16x192xf32> -> vector<16x192xf32>
    %c0_12 = arith.constant 0 : index
    %c0_13 = arith.constant 0 : index
    %10 = vector.load %arg7[%c0_12, %c0_13] : memref<16x1xf32, #tpu.memory_space<vmem>>, vector<16x1xf32>
    %11 = vector.broadcast %10 : vector<16x1xf32> to vector<16x192xf32>
    %12 = arith.addf %9, %11 : vector<16x192xf32>
    %cst_14 = arith.constant 0.000000e+00 : f32
    %13 = vector.broadcast %cst_14 : f32 to vector<16x192xf32>
    %14 = arith.maximumf %12, %13 : vector<16x192xf32>
    %15 = tpu.iota {dimensions = array<i32: 1>} : vector<1x192xi32>
    %c32_i32 = arith.constant 32 : i32
    %16 = vector.broadcast %c32_i32 : i32 to vector<1x192xi32>
    %17 = arith.cmpi sge, %15, %16 : vector<1x192xi32>
    %c0_i32 = arith.constant 0 : i32
    %18 = arith.cmpi ne, %arg1, %c0_i32 : i32
    %19 = vector.broadcast %18 : i1 to vector<1x192xi1>
    %20 = arith.ori %17, %19 : vector<1x192xi1>
    %c160_i32 = arith.constant 160 : i32
    %21 = vector.broadcast %c160_i32 : i32 to vector<1x192xi32>
    %22 = arith.cmpi slt, %15, %21 : vector<1x192xi32>
    %c1_i32 = arith.constant 1 : i32
    %23 = arith.cmpi ne, %arg1, %c1_i32 : i32
    %24 = vector.broadcast %23 : i1 to vector<1x192xi1>
    %25 = arith.ori %22, %24 : vector<1x192xi1>
    %26 = arith.andi %20, %25 : vector<1x192xi1>
    %27 = arith.extui %26 : vector<1x192xi1> to vector<1x192xi32>
    %28 = arith.sitofp %27 : vector<1x192xi32> to vector<1x192xf32>
    %29 = vector.broadcast %28 : vector<1x192xf32> to vector<16x192xf32>
    %30 = arith.mulf %14, %29 : vector<16x192xf32>
    %c0_15 = arith.constant 0 : index
    %c0_16 = arith.constant 0 : index
    %31 = vector.load %arg5[%c0_15, %c0_16] : memref<2x192xf32, #tpu.memory_space<vmem>>, vector<1x192xf32>
    %32 = vector.broadcast %31 : vector<1x192xf32> to vector<16x192xf32>
    %33 = arith.mulf %30, %32 : vector<16x192xf32>
    %c1 = arith.constant 1 : index
    %c0_17 = arith.constant 0 : index
    %34 = vector.load %arg5[%c1, %c0_17] : memref<2x192xf32, #tpu.memory_space<vmem>>, vector<1x192xf32>
    %35 = vector.broadcast %34 : vector<1x192xf32> to vector<16x192xf32>
    %36 = arith.mulf %30, %35 : vector<16x192xf32>
    %37 = vector.extract_strided_slice %33 {offsets = [0, 15], sizes = [16, 128], strides = [1, 1]} : vector<16x192xf32> to vector<16x128xf32>
    %38 = arith.truncf %37 : vector<16x128xf32> to vector<16x128xbf16>
    %39 = vector.extract_strided_slice %30 {offsets = [0, 16], sizes = [16, 128], strides = [1, 1]} : vector<16x192xf32> to vector<16x128xf32>
    %40 = arith.truncf %39 : vector<16x128xf32> to vector<16x128xbf16>
    %41 = vector.extract_strided_slice %36 {offsets = [0, 17], sizes = [16, 128], strides = [1, 1]} : vector<16x192xf32> to vector<16x128xf32>
    %42 = arith.truncf %41 : vector<16x128xf32> to vector<16x128xbf16>
    %43 = vector.extract_strided_slice %33 {offsets = [0, 31], sizes = [16, 128], strides = [1, 1]} : vector<16x192xf32> to vector<16x128xf32>
    %44 = arith.truncf %43 : vector<16x128xf32> to vector<16x128xbf16>
    %45 = vector.extract_strided_slice %30 {offsets = [0, 32], sizes = [16, 128], strides = [1, 1]} : vector<16x192xf32> to vector<16x128xf32>
    %46 = arith.truncf %45 : vector<16x128xf32> to vector<16x128xbf16>
    %47 = vector.extract_strided_slice %36 {offsets = [0, 33], sizes = [16, 128], strides = [1, 1]} : vector<16x192xf32> to vector<16x128xf32>
    %48 = arith.truncf %47 : vector<16x128xf32> to vector<16x128xbf16>
    %49 = vector.extract_strided_slice %33 {offsets = [0, 47], sizes = [16, 128], strides = [1, 1]} : vector<16x192xf32> to vector<16x128xf32>
    %50 = arith.truncf %49 : vector<16x128xf32> to vector<16x128xbf16>
    %51 = vector.extract_strided_slice %30 {offsets = [0, 48], sizes = [16, 128], strides = [1, 1]} : vector<16x192xf32> to vector<16x128xf32>
    %52 = arith.truncf %51 : vector<16x128xf32> to vector<16x128xbf16>
    %53 = vector.extract_strided_slice %36 {offsets = [0, 49], sizes = [16, 128], strides = [1, 1]} : vector<16x192xf32> to vector<16x128xf32>
    %54 = arith.truncf %53 : vector<16x128xf32> to vector<16x128xbf16>
    %55 = tpu.concatenate %38, %40, %42, %44, %46, %48, %50, %52, %54 in 0 : vector<16x128xbf16>, vector<16x128xbf16>, vector<16x128xbf16>, vector<16x128xbf16>, vector<16x128xbf16>, vector<16x128xbf16>, vector<16x128xbf16>, vector<16x128xbf16>, vector<16x128xbf16> -> vector<144x128xbf16>
    %c0_18 = arith.constant 0 : index
    %c0_19 = arith.constant 0 : index
    %56 = vector.load %arg8[%c0_18, %c0_19] : memref<16x144xbf16, #tpu.memory_space<vmem>>, vector<16x144xbf16>
    %cst_20 = arith.constant dense<0.000000e+00> : vector<16x128xf32>
    %57 = tpu.matmul %56, %55, %cst_20 {dimension_numbers = #tpu.dot_dimension_numbers<[1], [0], [0], [1], [0, 0, 1, 1], [], []>} : vector<16x144xbf16>, vector<144x128xbf16>, vector<16x128xf32> -> vector<16x128xf32>
    %c0_21 = arith.constant 0 : index
    %c0_22 = arith.constant 0 : index
    %58 = vector.load %arg9[%c0_21, %c0_22] : memref<16x1xf32, #tpu.memory_space<vmem>>, vector<16x1xf32>
    %59 = vector.broadcast %58 : vector<16x1xf32> to vector<16x128xf32>
    %60 = arith.addf %57, %59 : vector<16x128xf32>
    %cst_23 = arith.constant 0.000000e+00 : f32
    %61 = vector.broadcast %cst_23 : f32 to vector<16x128xf32>
    %62 = arith.maximumf %60, %61 : vector<16x128xf32>
    %63 = arith.truncf %62 : vector<16x128xf32> to vector<16x128xbf16>
    %c0_24 = arith.constant 0 : index
    %c0_25 = arith.constant 0 : index
    %64 = vector.load %arg10[%c0_24, %c0_25] : memref<4x16xbf16, #tpu.memory_space<vmem>>, vector<4x16xbf16>
    %cst_26 = arith.constant dense<0.000000e+00> : vector<4x128xf32>
    %65 = tpu.matmul %64, %63, %cst_26 {dimension_numbers = #tpu.dot_dimension_numbers<[1], [0], [0], [1], [0, 0, 1, 1], [], []>} : vector<4x16xbf16>, vector<16x128xbf16>, vector<4x128xf32> -> vector<4x128xf32>
    %c0_27 = arith.constant 0 : index
    %c0_28 = arith.constant 0 : index
    %66 = vector.load %arg11[%c0_27, %c0_28] : memref<4x1xf32, #tpu.memory_space<vmem>>, vector<4x1xf32>
    %67 = vector.broadcast %66 : vector<4x1xf32> to vector<4x128xf32>
    %68 = arith.addf %65, %67 : vector<4x128xf32>
    %cst_29 = arith.constant 0.000000e+00 : f32
    %69 = vector.broadcast %cst_29 : f32 to vector<4x128xf32>
    %70 = arith.maximumf %68, %69 : vector<4x128xf32>
    %c0_30 = arith.constant 0 : index
    %c0_31 = arith.constant 0 : index
    %c0_32 = arith.constant 0 : index
    %71 = vector.load %arg12[%c0_30, %c0_31, %c0_32] : memref<1x4x128xf32, #tpu.memory_space<vmem>>, vector<1x4x128xf32>
    %72 = vector.shape_cast %71 : vector<1x4x128xf32> to vector<4x128xf32>
    %73 = vector.shape_cast %70 : vector<4x128xf32> to vector<1x4x128xf32>
    tpu.vector_store %arg12[%c0_30, %c0_31, %c0_32], %73 {strides = array<i32>} : memref<1x4x128xf32, #tpu.memory_space<vmem>>, vector<1x4x128xf32>,
    return
  }
  func.func @transform_0(%arg0: i32, %arg1: i32) -> (i32, i32, i32, i32) {
    %c0_i32 = arith.constant 0 : i32
    %c0_i32_0 = arith.constant 0 : i32
    %c0_i32_1 = arith.constant 0 : i32
    return %arg0, %arg1, %c0_i32, %c0_i32_0 : i32, i32, i32, i32
  }
  func.func @transform_1(%arg0: i32, %arg1: i32) -> (i32, i32, i32) {
    %c0_i32 = arith.constant 0 : i32
    %c0_i32_0 = arith.constant 0 : i32
    return %arg0, %c0_i32, %arg1 : i32, i32, i32
  }
  func.func @transform_2(%arg0: i32, %arg1: i32) -> (i32, i32, i32, i32) {
    %c0_i32 = arith.constant 0 : i32
    %c0_i32_0 = arith.constant 0 : i32
    %c0_i32_1 = arith.constant 0 : i32
    return %arg0, %arg1, %c0_i32, %c0_i32_0 : i32, i32, i32, i32
  }
  func.func @transform_3(%arg0: i32, %arg1: i32) -> (i32, i32) {
    %c0_i32 = arith.constant 0 : i32
    %c0_i32_0 = arith.constant 0 : i32
    %c0_i32_1 = arith.constant 0 : i32
    return %c0_i32, %c0_i32_0 : i32, i32
  }
  func.func @transform_4(%arg0: i32, %arg1: i32) -> (i32, i32) {
    %c0_i32 = arith.constant 0 : i32
    %c0_i32_0 = arith.constant 0 : i32
    %c0_i32_1 = arith.constant 0 : i32
    return %c0_i32, %c0_i32_0 : i32, i32
  }
  func.func @transform_5(%arg0: i32, %arg1: i32) -> (i32, i32) {
    %c0_i32 = arith.constant 0 : i32
    %c0_i32_0 = arith.constant 0 : i32
    %c0_i32_1 = arith.constant 0 : i32
    return %c0_i32, %c0_i32_0 : i32, i32
  }
  func.func @transform_6(%arg0: i32, %arg1: i32) -> (i32, i32) {
    %c0_i32 = arith.constant 0 : i32
    %c0_i32_0 = arith.constant 0 : i32
    %c0_i32_1 = arith.constant 0 : i32
    return %c0_i32, %c0_i32_0 : i32, i32
  }
  func.func @transform_7(%arg0: i32, %arg1: i32) -> (i32, i32) {
    %c0_i32 = arith.constant 0 : i32
    %c0_i32_0 = arith.constant 0 : i32
    %c0_i32_1 = arith.constant 0 : i32
    return %c0_i32, %c0_i32_0 : i32, i32
  }
  func.func @transform_8(%arg0: i32, %arg1: i32) -> (i32, i32) {
    %c0_i32 = arith.constant 0 : i32
    %c0_i32_0 = arith.constant 0 : i32
    %c0_i32_1 = arith.constant 0 : i32
    return %c0_i32, %c0_i32_0 : i32, i32
  }
  func.func @transform_9(%arg0: i32, %arg1: i32) -> (i32, i32) {
    %c0_i32 = arith.constant 0 : i32
    %c0_i32_0 = arith.constant 0 : i32
    %c0_i32_1 = arith.constant 0 : i32
    return %c0_i32, %c0_i32_0 : i32, i32
  }
  func.func @transform_10(%arg0: i32, %arg1: i32) -> (i32, i32, i32) {
    %c0_i32 = arith.constant 0 : i32
    %c0_i32_0 = arith.constant 0 : i32
    return %arg0, %c0_i32, %arg1 : i32, i32, i32
  }
}

</mosaic_0001>

<bundles_post_ra>
// kernel: tpu_custom_call.1
= control target key start
LH: loop header
LB: loop body
LE: loop exit
PB: predicated region body
PF: predicated region fallthrough
CT: control target
= control target key end

     0   :  { %15 = vsyncpa [#allocation3], 0  ;;  %s1589_s0 = inlined_call_operand.vmem [shape: f32[2,2,4,32], index: 0, kind: input, shape index: {}]   ;;  %s1590_s1 = inlined_call_operand.vmem [shape: f32[2,4,256], index: 1, kind: input, shape index: {}]   ;;  %s1591_s2 = inlined_call_operand.vmem [shape: f32[2,2,4,32], index: 2, kind: input, shape index: {}]   ;;  %s1592_s3 = inlined_call_operand.hbm [shape: f32[2,192], index: 3, kind: input, shape index: {}]   ;;  %s1593_s4 = inlined_call_operand.vmem [shape: bf16[16,4], index: 4, kind: input, shape index: {}]   ;;  %s1594_s5 = inlined_call_operand.vmem [shape: f32[16,1], index: 5, kind: input, shape index: {}]   ;;  %s1595_s6 = inlined_call_operand.vmem [shape: bf16[16,144], index: 6, kind: input, shape index: {}]   ;;  %s1596_s7 = inlined_call_operand.vmem [shape: f32[16,1], index: 7, kind: input, shape index: {}]   ;;  %s1597_s8 = inlined_call_operand.vmem [shape: bf16[4,16], index: 8, kind: input, shape index: {}]   ;;  %s1598_s9 = inlined_call_operand.vmem [shape: f32[4,1], index: 9, kind: input, shape index: {}]   ;;  %s1599_s10 = inlined_call_operand.hbm [shape: f32[2,4,256], index: 10, kind: output, shape index: {}]  }
   0x1   :  { %16 = vsyncpa [#allocation4], 0 }
   0x2   :  { %18 = vsyncpa [#allocation4 + $0x1], 0  ;;  %s1334_s13 = smov 0   ;;  %s1336_s14 = smov 0  }
   0x3   :  { %s1338_s15 = smov 0   ;;  %s1340_s16 = smov 0  }
   0x4   :  { %s1342_s17 = smov 0   ;;  %s1344_s18 = smov 0  }
   0x5   :  { %s1346_s19 = smov 0   ;;  %s1348_s20 = smov 0  }
   0x6 LB: > { %1608 = sst [smem:[#allocation8_spill]] %s1254_s18  ;;  %s994_s21 = sadd.s32 4294967295, %s1262_s20   ;;  %s1262_s20 = sphi %s1348_s20, %s24_s20   ;;  %s1258_s19 = sphi %s1346_s19, %s1626_s19   ;;  %s1254_s18 = sphi %s1344_s18, %s1625_s18   ;;  %s1250_s17 = sphi %s1342_s17, %s1624_s17   ;;  %s1246_s16 = sphi %s1340_s16, %s1623_s16   ;;  %s1242_s15 = sphi %s1338_s15, %s1629_s15   ;;  %s1238_s14 = sphi %s1336_s14, %s1628_s14   ;;  %s1234_s13 = sphi %s1334_s13, %s1627_s13  }
   0x7   : > { %1609 = sst [smem:[#allocation9_spill]] %s1258_s19  ;;  %s995_s22 = sadd.s32 4294967294, %s1262_s20  }
   0x8   : > { %s33_s23 = sadd.s32 1, %s1254_s18  ;;  %s36_s24 = sadd.s32 1, %s1258_s19 }
   0x9   : > { %p34_p0 = scmp.ge.s32.totalorder %s33_s23, 2  ;;  %s276_s25 = sadd.s32 1, %s1242_s15 }
   0xa   : > { %p286_p1 = scmp.ne.s32.totalorder %s1242_s15, %s1238_s14  ;;  %p287_p2 = scmp.eq.s32.totalorder %s994_s21, 3 }
   0xb   : > { %s1631_s23 = smov (%p34_p0, %s33_s23), 0  ;;  %s1633_s24 = smov (!%p34_p0, %s36_s24), %s1258_s19 }
   0xc   : > { %1610 = sst [smem:[#allocation10_spill]] %s1631_s23  ;;  %s272_s26 = ssub.s32 %s1254_s18, %s1631_s23 }
   0xd   : > { %p1386_p3 = por %p287_p2, %p286_p1  ;;  %p38_p4 = scmp.ge.s32.totalorder %s1633_s24, 2 }
   0xe   : > { %p292_p5 = scmp.ne.s32.totalorder %s1238_s14, %s1234_s13  ;;  %p293_p6 = scmp.eq.s32.totalorder %s995_s22, 3 }
   0xf   : > { %s1611_s27 = scalar_select %p1386_p3, 1, 0 }
  0x10   : > { %p996_p7 = scmp.ge.s32.totalorder %s1262_s20, 1  ;;  %s1635_s24 = smov (%p38_p4, %s1633_s24), 0 }
  0x11   : > { %1612 = sst [smem:[#allocation11_spill]] %s1635_s24  ;;  %p1395_p8 = por %p293_p6, %p292_p5 }
  0x12   : > { %p300_p9 = scmp.lt.s32.totalorder %s1262_s20, 5  ;;  %s271_s29 = ssub.s32 %s1258_s19, %s1635_s24 }
  0x13   : > { %s1613_s28 = scalar_select %p1395_p8, 1, 0 }
  0x14   : > { %s273_s30 = sor.u32 %s272_s26, %s271_s29  ;;  %p1402_p10 = pnand %p996_p7, %p300_p9 }
  0x15   : > { %p274_p11 = scmp.eq.s32.totalorder %s273_s30, 0  ;;  %p1406_p12 = scmp.eq.s32.totalorder %s994_s21, 0 }
  0x16   : > { %s1614_s11 = scalar_select %p1402_p10, 1, 0 }
  0x17   : > { %s1615_s12 = scalar_select %p1406_p12, 1, 0 }
  0x18   : > { %p1036_p13 = pneg %p1402_p10  ;;  %s1264_s23 = smov [#allocation2]  }
  0x19   : > { %s1413_s22 = scalar_select %p274_p11, %s1242_s15, %s276_s25  }
  0x1a   : > { %s313_s18 = sshll.u32 %s1264_s23, 4  ;;  %p1417_p0 = pnand %p1406_p12, %p1036_p13  ;;  %s314_s18 = int_to_ptr.vmem [resolvable:$true] %s313_s18 }
  0x1b   : > { %1616 = sst [smem:[#allocation12_spill]] %s1413_s22  ;;  %s1136_s21 = scalar_lea.hbm %s1592_s3, 64 }
  0x1c   : > { %p1137_p1 = scmp.ne.s32.totalorder %s1592_s3, %s1136_s21  ;;  %p1138_p2 = pneg %p1417_p0 }
  0x1d   : > { %p1143_p6 = scmp.lt.u32.totalorder %s1136_s21, %s1592_s3 }
  0x1e   : > { %p1139_p4 = pnand %p1138_p2, %p1137_p1 }
  0x20   : > { %p1140_p5 = pneg %p1139_p4 }
  0x22   : > { %p1145_p7 = pnand %p1143_p6, %p1140_p5 }
  0x24   : > { %1148 = shalt.err (!%p1145_p7)
}
  0x25   : > { %s1149_s22 = scalar_lea.vmem %s314_s18, 64  ;;  %p1157_p8 = scmp.lt.s32.totalorder %s314_s18, %s314_s18 }
  0x26   : > { %p1150_p9 = scmp.ne.s32.totalorder %s314_s18, %s1149_s22  ;;  %p1158_p3 = scmp.lt.s32.totalorder %s1149_s22, %s1149_s22 }
  0x28   : > { %p1152_p11 = pnand %p1150_p9, %p1138_p2  ;;  %p1159_p12 = por %p1158_p3, %p1157_p8 }
  0x2a   : > { %p1153_p13 = pneg %p1152_p11 }
  0x2c   : > { %p1160_p10 = pnand %p1159_p12, %p1153_p13 }
  0x2e   : > { %1163 = shalt.err (!%p1160_p10)
}
  0x2f   : > { %1039 = dma.hbm_to_vmem [thread:$0]  (!%p1417_p0), %s1592_s3, 64, %s314_s18, [#allocation3]  }
  0x30   : > { %p1618_p1 = scmp.ne.s32.totalorder %s1614_s11, 0 }
  0x31   : > { %p1619_p4 = scmp.ne.s32.totalorder (!%p1618_p1), %s1615_s12, 0 }
  0x32   : > { %377 = sbr.rel (%p1618_p1) target bundleno = 1136 (0x470), region = 60 }
  0x39   : > { %1225 = dma.done.wait (%p1619_p4), [#allocation3], 64  }
  0x3a   : > { %1227 = vsyncadd (%p1619_p4), [#allocation3], 4294967232  ;;  %p434_p3 = scmp.lt.s32.totalorder %s1250_s17, 1  ;;  %p436_p8 = scmp.lt.s32.totalorder %s1246_s16, 1  ;;  %v1265_v0 = vmov 0   ;;  %v478_v4 = vld [vmem:[%s1594_s5 + $0x8] sm:$0xff]  ;;  %v552_v17 = vlaneseq }
  0x3b   : > { %537 = vmatprep.mubr.bf16.mxu0 %v1265_v0  ;;  %1130 = vset.pattern.permute.xlu0 %v1265_v0  ;;  %v477_v5 = vld [vmem:[%s1594_s5] sm:$0xff]  ;;  %vm470_vm0 = vcmask 261120   ;;  %vm498_vm1 = vcmask 1041408   ;;  %vm494_vm2 = vcmask 31744   ;;  %v1267_v16 = vmov 0.0   ;;  %p557_p10 = scmp.ne.s32.totalorder %s1246_s16, 0 }
  0x3c   : > { %s435_s22 = scalar_select %p434_p3, %s1250_s17, 1  ;;  %1131 = vset.pattern.permute.xlu1 %v1265_v0  ;;  %756 = vmatprep.subr.bf16.mxu1 %v1265_v0  ;;  %v1132_v15 = vld [vmem:[%s1593_s4] sm:$0xff]   ;;  %v553_v18 = vand.u32 127, %v552_v17  ;;  %v584_v22 = vshrl.u32 %v552_v17, 7  ;;  %vm626_vm9 = vcmask 1039360   ;;  %vm634_vm10 = vcmask 1031168  }
  0x3d   : > { %s437_s26 = scalar_select %p436_p8, %s1246_s16, 1  ;;  %486 = vperm.xlu1 %1131, %v478_v4   ;;  %v598_v27 = vld [vmem:[#allocation2 + $0x1] ss:$2 sm:$0x3]  ;;  %vm642_vm11 = vcmask 916480   ;;  %vm648_vm12 = vcmask 908288  }
  0x3e   : > { %s1002_s29 = sshll.u32 %s435_s22, 1  ;;  %p565_p12 = scmp.ne.s32.totalorder %s1246_s16, 1  ;;  %v554_v20 = vadd.s32 128, %v553_v18  ;;  %vm555_vm3 = vcmp.ge.s32.totalorder %v553_v18, 32  ;;  %v585_v26 = vsub.s32 0, %v584_v22  ;;  %v589_v31 = vsub.s32 1, %v584_v22 }
  0x3f   : > { %s439_s30 = sadd.s32 %s1002_s29, %s437_s26  ;;  %s1266_s26 = smov 32   ;;  %v581_v30 = vld [vmem:[#allocation2] ss:$2 sm:$0x3]  ;;  %vm654_vm13 = vcmask 900096   ;;  %vm660_vm14 = vcmask 785408  }
  0x40   : > { %s1003_s18 = sshll.u32 %s439_s30, 2  ;;  %vm564_vm5 = vcmp.lt.s32.totalorder %v554_v20, 160  ;;  %v603_v41 = vrot.slane %v598_v27, %v585_v26  ;;  %v586_v42 = vrot.slane %v581_v30, %v585_v26  ;;  %v607_v45 = vrot.slane %v598_v27, %v589_v31  ;;  %s1268_s24 = smov 127  }
  0x41   : > { %s449_s21 = scalar_lea.vmem %s1590_s1, %s1003_s18  ;;  %s457_s19 = scalar_lea.vmem %s1591_s2, %s1003_s18  ;;  %v590_v48 = vrot.slane %v581_v30, %v589_v31  ;;  %vm752_vm15 = vcmask 130048  }
  0x42   : > { %v460_v1 = vld [vmem:[%s449_s21] sm:$0xf]  ;;  %s441_s23 = scalar_lea.vmem %s1589_s0, %s1003_s18  ;;  %s1269_s22 = smov 126  }
  0x43   : > { %v461_v2 = vld [vmem:[%s457_s19] sm:$0xf]  ;;  %s558_s18 = scalar_select %p557_p10, 1, 0 }
  0x44   : > { %v1125_v3 = vpack.i.bf16 %v461_v2, %v460_v1  ;;  %v459_v7 = vld [vmem:[%s441_s23] sm:$0xf]  ;;  %s566_s19 = scalar_select %p565_p12, 1, 0 }
  0x45   : > { %v559_v19 = vstv %s558_s18  ;;  %s1271_s29 = smov 111   ;;  %s1272_s30 = smov 110  }
  0x46   : > { %1126 = vrot.lane.b32.xlu0 %v1125_v3, %s1266_s26  ;;  %v567_v21 = vstv %s566_s19  ;;  %vm560_vm4 = vcmp.eq.s32.totalorder %v559_v19, 1  ;;  %s1270_s26 = smov 112   ;;  %s1273_s11 = smov 96   ;;  %v1135_v19 = vld [vmem:[%s1595_s6 + $0x4] ss:$8 sps:$4 sm:$0xff]  }
  0x47   : > { %vm568_vm6 = vcmp.eq.s32.totalorder %v567_v21, 1  ;;  %vm561_vm7 = vmor %vm555_vm3, %vm560_vm4  ;;  %s1274_s12 = smov 95   ;;  %s1275_s23 = smov 94   ;;  %1015 = vmatprep.mubr.msk.bf16.mxu1 %vm752_vm15, %v1135_v19  ;;  %vm1277_vm3 = vmmov 0  }
  0x48   : > { %vm570_vm8 = vmor %vm564_vm5, %vm568_vm6  ;;  %v1011_v32 = vsel %vm561_vm7, 1.0, %v1267_v16  ;;  %s1276_s21 = smov 113   ;;  %s431_s25 = sand.u32 1, %s1238_s14  }
  0x49   : > { %v1012_v36 = vsel %vm570_vm8, 1.0, %v1267_v16  ;;  %s1001_s18 = sshll.u32 %s431_s25, 2  ;;  %s1018_s19 = sshll.u32 %s1250_s17, 1 }
  0x4a   : > { %481 = vperm.xlu0 %1130, %v477_v5   ;;  %p1620_p2 = scmp.ne.s32.totalorder %s1611_s27, 0 }
  0xb8   : > { %v1127_v6 = vpop.permute.xlu0 %1126 }
  0xb9   : > { %v1129_v8 = vunpack.i.h.bf16 %v1127_v6  ;;  %v1128_v9 = vunpack.i.l.bf16 %v1127_v6 }
  0xbb   : > { %v472_v10 = vsel %vm470_vm0, %v1128_v9, %v1129_v8  ;;  %v471_v11 = vsel %vm470_vm0, %v459_v7, %v1128_v9  ;;  %vm666_vm0 = vcmask 777216  }
  0xbc   : > { %v474_v12 = vpack.c.bf16 %v472_v10, %v472_v10  ;;  %v473_v13 = vpack.c.bf16 %v471_v11, %v471_v11  ;;  %v487_v25 = vpop.permute.xlu1 %486 }
  0xbe   : > { %1009 = vmatprep.subr.msk.bf16.mxu0 %vm498_vm1, %v474_v12  ;;  %v500_v14 = vsel %vm498_vm1, %v473_v13, 0  ;;  %vm672_vm1 = vcmask 769024  }
  0xbf   : > { %506 = vmatpush1.bf16.msra.mxu0 %v500_v14 }
  0xc0   : > { %1024 = vmatprep.subr.bf16.mxu0 %v1267_v16 }
  0xc2   : > { %1010 = vmatmul.mubr.msk.bf16.vlgmr.msra.gmra.mrb[0].mxu0 %vm494_vm2, %v1132_v15  ;;  %vm733_vm2 = vcmask 924672  }
  0xc3   : > { %1026 = vmatprep.mubr.msk.bf16.mxu0 %vm1277_vm3, %v1267_v16 }
  0xc9   : > { %v482_v23 = vpop.permute.xlu0 %481 }
 0x195   : > { %v539_v24 = vpop.f32.mrb[0].mxu0 }
 0x196   : > { %v540_v28 = vadd.f32 %v539_v24, %v482_v23  ;;  %v541_v29 = vpop.f32.mrb[1].mxu0 }
 0x197   : > { %v542_v33 = vadd.f32 %v541_v29, %v482_v23  ;;  %v543_v34 = vpop.f32.mrb[2].mxu0  ;;  %v676_v29 = vld [vmem:[%s1596_s7] sm:$0xff] }
 0x198   : > { %v548_v35 = vmax.f32 %v540_v28, 0.0  ;;  %v544_v37 = vadd.f32 %v543_v34, %v487_v25  ;;  %v545_v38 = vpop.f32.mrb[3].mxu0  ;;  %v677_v28 = vld [vmem:[%s1596_s7 + $0x8] sm:$0xff] }
 0x199   : > { %v549_v39 = vmax.f32 %v542_v33, 0.0  ;;  %v546_v40 = vadd.f32 %v545_v38, %v487_v25  ;;  %v801_v33 = vld [vmem:[%s1598_s9] sm:$0xf] }
 0x19a   : > { %v577_v43 = vmul.f32 %v1011_v32, %v548_v35  ;;  %v550_v44 = vmax.f32 %v544_v37, 0.0 }
 0x19b   : > { %v578_v46 = vmul.f32 %v1012_v36, %v549_v39  ;;  %v551_v47 = vmax.f32 %v546_v40, 0.0 }
 0x19c   : > { %v579_v49 = vmul.f32 %v1011_v32, %v550_v44  ;;  %v610_v51 = vmul.f32 %v603_v41, %v577_v43  ;;  %v593_v52 = vmul.f32 %v586_v42, %v577_v43 }
 0x19d   : > { %v580_v50 = vmul.f32 %v1012_v36, %v551_v47  ;;  %v611_v56 = vmul.f32 %v607_v45, %v578_v46  ;;  %v594_v59 = vmul.f32 %v590_v48, %v578_v46 }
 0x19e   : > { %v616_v53 = vpack.c.bf16 %v579_v49, %v577_v43  ;;  %v612_v54 = vmul.f32 %v603_v41, %v579_v49  ;;  %v595_v55 = vmul.f32 %v586_v42, %v579_v49 }
 0x19f   : > { %v617_v57 = vpack.c.bf16 %v580_v50, %v578_v46  ;;  %v613_v58 = vmul.f32 %v607_v45, %v580_v50  ;;  %v596_v60 = vmul.f32 %v590_v48, %v580_v50 }
 0x1a0   : > { %622 = vrot.lane.b32.xlu1 %v616_v53, %s1268_s24  ;;  %v618_v61 = vpack.c.bf16 %v612_v54, %v610_v51  ;;  %v614_v62 = vpack.c.bf16 %v595_v55, %v593_v52 }
 0x1a1   : > { %v619_v63 = vpack.c.bf16 %v613_v58, %v611_v56  ;;  %v615_v1 = vpack.c.bf16 %v596_v60, %v594_v59  ;;  %v1133_v58 = vld [vmem:[%s1595_s6] ss:$8 sps:$4 sm:$0xff]  }
 0x1a2   : > { %630 = vrot.lane.b32.xlu0 %v618_v61, %s1269_s22 }
 0x1a4   : > { %624 = vrot.lane.b32.xlu1 %v617_v57, %s1268_s24  ;;  %s864_s24 = sadd.s32 %s1246_s16, %s1018_s19  ;;  %s853_s16 = scalar_lea.sflag [#allocation4], %s431_s25 }
 0x1a6   : > { %638 = vrot.lane.b32.xlu0 %v614_v62, %s1270_s26 }
 0x1a8   : > { %632 = vrot.lane.b32.xlu1 %v619_v63, %s1269_s22  ;;  %s1019_s22 = sshll.u32 %s864_s24, 6 }
 0x1aa   : > { %644 = vrot.lane.b32.xlu0 %v616_v53, %s1271_s29 }
 0x1ac   : > { %640 = vrot.lane.b32.xlu1 %v615_v1, %s1270_s26  ;;  %s433_s26 = scalar_lea.vmem [#allocation5], %s1001_s18 }
 0x1ae   : > { %650 = vrot.lane.b32.xlu0 %v618_v61, %s1272_s30 }
 0x1b0   : > { %646 = vrot.lane.b32.xlu1 %v617_v57, %s1271_s29  ;;  %s868_s29 = sshll.u32 %s433_s26, 4  ;;  %s1538_s29 = int_to_ptr.vmem [resolvable:$true] %s868_s29 }
 0x1b1   : > { %s1164_s17 = scalar_lea.vmem %s1538_s29, 64 }
 0x1b2   : > { %656 = vrot.lane.b32.xlu0 %v614_v62, %s1273_s11  ;;  %p1165_p0 = scmp.ne.s32.totalorder %s1538_s29, %s1164_s17 }
 0x1b4   : > { %652 = vrot.lane.b32.xlu1 %v619_v63, %s1272_s30  ;;  %p1166_p5 = pnand %p1165_p0, %p1620_p2 }
 0x1b6   : > { %662 = vrot.lane.b32.xlu0 %v616_v53, %s1274_s12  ;;  %p1167_p6 = pneg %p1166_p5 }
 0x1b8   : > { %658 = vrot.lane.b32.xlu1 %v615_v1, %s1273_s11 }
 0x1ba   : > { %668 = vrot.lane.b32.xlu0 %v618_v61, %s1275_s23 }
 0x1bc   : > { %664 = vrot.lane.b32.xlu1 %v617_v57, %s1274_s12  ;;  %s1536_s12 = scalar_lea.hbm %s1599_s10, %s1019_s22 }
 0x1be   : > { %697 = vrot.lane.b32.xlu0 %v614_v62, %s1276_s21 }
 0x1c0   : > { %670 = vrot.lane.b32.xlu1 %v619_v63, %s1275_s23  ;;  %s1278_s23 = smov [#allocation5]  }
 0x1c4   : > { %699 = vrot.lane.b32.xlu1 %v615_v1, %s1276_s21 }
 0x212   : > { %v623_v2 = vpop.permute.xlu1 %622 }
 0x214   : > { %v631_v3 = vpop.permute.xlu0 %630 }
 0x216   : > { %v625_v4 = vpop.permute.xlu1 %624 }
 0x217   : > { %703 = vrot.lane.b32.xlu1 %v625_v4, %s1276_s21  ;;  %v627_v5 = vsel %vm626_vm9, %v623_v2, %v625_v4 }
 0x218   : > { %701 = vrot.lane.b32.xlu0 %v627_v5, %s1276_s21  ;;  %v639_v6 = vpop.permute.xlu0 %638 }
 0x21a   : > { %v633_v7 = vpop.permute.xlu1 %632 }
 0x21b   : > { %707 = vrot.lane.b32.xlu1 %v633_v7, %s1276_s21  ;;  %v635_v8 = vsel %vm634_vm10, %v631_v3, %v633_v7 }
 0x21c   : > { %705 = vrot.lane.b32.xlu0 %v635_v8, %s1276_s21  ;;  %v645_v9 = vpop.permute.xlu0 %644 }
 0x21e   : > { %v641_v10 = vpop.permute.xlu1 %640 }
 0x21f   : > { %711 = vrot.lane.b32.xlu1 %v641_v10, %s1276_s21  ;;  %v643_v11 = vsel %vm642_vm11, %v639_v6, %v641_v10  ;;  %v800_v6 = vld [vmem:[%s1597_s8] sm:$0x3] }
 0x220   : > { %709 = vrot.lane.b32.xlu0 %v643_v11, %s1276_s21  ;;  %v651_v12 = vpop.permute.xlu0 %650 }
 0x222   : > { %v647_v13 = vpop.permute.xlu1 %646 }
 0x223   : > { %715 = vrot.lane.b32.xlu1 %v647_v13, %s1276_s21  ;;  %v649_v14 = vsel %vm648_vm12, %v645_v9, %v647_v13 }
 0x224   : > { %713 = vrot.lane.b32.xlu0 %v649_v14, %s1276_s21  ;;  %v657_v15 = vpop.permute.xlu0 %656 }
 0x226   : > { %v653_v17 = vpop.permute.xlu1 %652 }
 0x227   : > { %719 = vrot.lane.b32.xlu1 %v653_v17, %s1276_s21  ;;  %v655_v18 = vsel %vm654_vm13, %v651_v12, %v653_v17 }
 0x228   : > { %717 = vrot.lane.b32.xlu0 %v655_v18, %s1276_s21  ;;  %v663_v20 = vpop.permute.xlu0 %662 }
 0x22a   : > { %v659_v21 = vpop.permute.xlu1 %658 }
 0x22b   : > { %723 = vrot.lane.b32.xlu1 %v659_v21, %s1276_s21  ;;  %v661_v22 = vsel %vm660_vm14, %v657_v15, %v659_v21 }
 0x22c   : > { %721 = vrot.lane.b32.xlu0 %v661_v22, %s1276_s21  ;;  %v669_v25 = vpop.permute.xlu0 %668 }
 0x22e   : > { %v665_v23 = vpop.permute.xlu1 %664 }
 0x22f   : > { %727 = vrot.lane.b32.xlu1 %v665_v23, %s1276_s21  ;;  %v667_v24 = vsel %vm666_vm0, %v663_v20, %v665_v23 }
 0x230   : > { %725 = vrot.lane.b32.xlu0 %v667_v24, %s1276_s21  ;;  %v698_v30 = vpop.permute.xlu0 %697 }
 0x232   : > { %v671_v26 = vpop.permute.xlu1 %670 }
 0x233   : > { %731 = vrot.lane.b32.xlu1 %v671_v26, %s1276_s21  ;;  %v673_v27 = vsel %vm672_vm1, %v669_v25, %v671_v26 }
 0x234   : > { %729 = vrot.lane.b32.xlu0 %v673_v27, %s1276_s21  ;;  %s1168_s21 = sshll.u32 %s1278_s23, 4  ;;  %s1169_s21 = int_to_ptr.vmem [resolvable:$false] %s1168_s21 }
 0x235   : > { %s1170_s18 = scalar_lea.vmem %s1169_s21, 128  ;;  %p1171_p7 = scmp.lt.s32.totalorder %s1538_s29, %s1169_s21 }
 0x236   : > { %v700_v31 = vpop.permute.xlu1 %699  ;;  %p1172_p9 = scmp.lt.s32.totalorder %s1170_s18, %s1164_s17 }
 0x237   : > { %685 = vperm.xlu1 %1131, %v677_v28   ;;  %v734_v32 = vsel %vm733_vm2, %v698_v30, %v700_v31 }
 0x238   : > { %680 = vperm.xlu0 %1130, %v676_v29   ;;  %757 = vmatpush1.bf16.msra.mxu1 %v734_v32  ;;  %p1173_p11 = por %p1172_p9, %p1171_p7 }
 0x239   : > { %758 = vmatprep.subr.bf16.mxu1 %v1265_v0 }
 0x23a   : > { %p1174_p13 = pnand %p1173_p11, %p1167_p6 }
 0x23c   : > { %804 = vperm.xlu0 %1130, %v801_v33  }
 0x289   : > { %v704_v34 = vpop.permute.xlu1 %703 }
 0x28a   : > { %v702_v35 = vpop.permute.xlu0 %701 }
 0x28b   : > { %v735_v36 = vsel %vm733_vm2, %v702_v35, %v704_v34 }
 0x28c   : > { %759 = vmatpush1.bf16.msra.mxu1 %v735_v36 }
 0x28d   : > { %v708_v37 = vpop.permute.xlu1 %707  ;;  %760 = vmatprep.subr.bf16.mxu1 %v1265_v0 }
 0x28e   : > { %v706_v38 = vpop.permute.xlu0 %705 }
 0x28f   : > { %v736_v39 = vsel %vm733_vm2, %v706_v38, %v708_v37 }
 0x290   : > { %761 = vmatpush1.bf16.msra.mxu1 %v736_v39 }
 0x291   : > { %v712_v40 = vpop.permute.xlu1 %711  ;;  %762 = vmatprep.subr.bf16.mxu1 %v1265_v0 }
 0x292   : > { %v710_v41 = vpop.permute.xlu0 %709 }
 0x293   : > { %v737_v42 = vsel %vm733_vm2, %v710_v41, %v712_v40 }
 0x294   : > { %763 = vmatpush1.bf16.msra.mxu1 %v737_v42 }
 0x295   : > { %v716_v43 = vpop.permute.xlu1 %715  ;;  %764 = vmatprep.subr.bf16.mxu1 %v1265_v0 }
 0x296   : > { %v714_v44 = vpop.permute.xlu0 %713 }
 0x297   : > { %v738_v45 = vsel %vm733_vm2, %v714_v44, %v716_v43 }
 0x298   : > { %765 = vmatpush1.bf16.msra.mxu1 %v738_v45 }
 0x299   : > { %v720_v46 = vpop.permute.xlu1 %719  ;;  %766 = vmatprep.subr.bf16.mxu1 %v1265_v0 }
 0x29a   : > { %v718_v47 = vpop.permute.xlu0 %717 }
 0x29b   : > { %v739_v48 = vsel %vm733_vm2, %v718_v47, %v720_v46 }
 0x29c   : > { %767 = vmatpush1.bf16.msra.mxu1 %v739_v48 }
 0x29d   : > { %v724_v49 = vpop.permute.xlu1 %723  ;;  %768 = vmatprep.subr.bf16.mxu1 %v1265_v0 }
 0x29e   : > { %v722_v50 = vpop.permute.xlu0 %721 }
 0x29f   : > { %v740_v51 = vsel %vm733_vm2, %v722_v50, %v724_v49 }
 0x2a0   : > { %769 = vmatpush1.bf16.msra.mxu1 %v740_v51 }
 0x2a1   : > { %v728_v52 = vpop.permute.xlu1 %727  ;;  %770 = vmatprep.subr.bf16.mxu1 %v1265_v0 }
 0x2a2   : > { %v726_v53 = vpop.permute.xlu0 %725 }
 0x2a3   : > { %v741_v54 = vsel %vm733_vm2, %v726_v53, %v728_v52 }
 0x2a4   : > { %771 = vmatpush1.bf16.msra.mxu1 %v741_v54 }
 0x2a5   : > { %v732_v55 = vpop.permute.xlu1 %731  ;;  %772 = vmatprep.subr.bf16.mxu1 %v1265_v0 }
 0x2a6   : > { %v730_v56 = vpop.permute.xlu0 %729 }
 0x2a7   : > { %v742_v57 = vsel %vm733_vm2, %v730_v56, %v732_v55 }
 0x2a8   : > { %773 = vmatpush1.bf16.msra.mxu1 %v742_v57 }
 0x2ab   : > { %789 = vmatmul.mubr.bf16.vlgmr.msra.gmra.mrb[0].mxu1 %v1133_v58 }
 0x2b6   : > { %v686_v0 = vpop.permute.xlu1 %685 }
 0x2b7   : > { %v681_v59 = vpop.permute.xlu0 %680 }
 0x2bb   : > { %v805_v16 = vpop.permute.xlu0 %804 }
 0x37e   : > { %v790_v60 = vpop.f32.mrb[0].mxu1 }
 0x37f   : > { %v791_v61 = vadd.f32 %v790_v60, %v681_v59  ;;  %v792_v62 = vpop.f32.mrb[1].mxu1 }
 0x380   : > { %v793_v63 = vpop.f32.mrb[2].mxu1 }
 0x381   : > { %v794_v1 = vadd.f32 %v793_v63, %v686_v0  ;;  %v795_v2 = vpop.f32.mrb[3].mxu1  ;;  %v797_v3 = vmax.f32 %v791_v61, 0.0 }
 0x383   : > { %v798_v4 = vmax.f32 %v794_v1, 0.0 }
 0x385   : > { %v799_v5 = vpack.c.bf16 %v798_v4, %v797_v3 }
 0x387   : > { %1025 = vmatpush3.bf16.msra.mxu0 %v799_v5 }
 0x38a   : > { %1027 = vmatmul.mubr.msk.bf16.vlgmr.msra.gmra.mrb[4].mxu0 %vm752_vm15, %v800_v6 }
 0x45d   : > { %v844_v7 = vpop.f32.mrb[4].mxu0 }
 0x45e   : > { %v845_v8 = vadd.f32 %v844_v7, %v805_v16  ;;  %v1028_v9 = vpop.f32.mrb[5].mxu0 }
 0x45f   : > { %v847_v10 = vpop.f32.mrb[6].mxu0 }
 0x460   : > { %v850_v11 = vmax.f32 %v845_v8, 0.0  ;;  %v1029_v12 = vpop.f32.mrb[7].mxu0 }
 0x462   : > { %851 = vst [vmem:[%s433_s26] sm:$0xf] %v850_v11 }
 0x463   : > { %1177 = shalt.err (!%p1174_p13)
}
 0x464   : > { %s1178_s25 = scalar_lea.hbm %s1536_s12, 64  ;;  %s1182_s22 = scalar_lea.hbm %s1599_s10, 256 }
 0x465   : > { %p1179_p1 = scmp.ne.s32.totalorder %s1536_s12, %s1178_s25  ;;  %p1183_p8 = scmp.lt.u32.totalorder %s1536_s12, %s1599_s10 }
 0x466   : > { %p1184_p10 = scmp.lt.u32.totalorder %s1182_s22, %s1178_s25  ;;  %p1186_p0 = scmp.lt.u32.totalorder %s1178_s25, %s1536_s12 }
 0x467   : > { %p1180_p4 = pnand %p1179_p1, %p1620_p2 }
 0x468   : > { %p1185_p12 = por %p1184_p10, %p1183_p8 }
 0x469   : > { %p1181_p3 = pneg %p1180_p4 }
 0x46a   : > { %p1187_p5 = por %p1186_p0, %p1185_p12 }
 0x46c   : > { %p1188_p6 = pnand %p1187_p5, %p1181_p3 }
 0x46e   : > { %1191 = shalt.err (!%p1188_p6)
}
 0x46f   : > { %1034 = dma.vmem_to_hbm [thread:$0]  (%p1620_p2), %s1538_s29, 64, %s1536_s12, %s853_s16  }
 0x470 PF: > { %p1046_p7 = scmp.ge.s32.totalorder %s1262_s20, 2  ;;  %s880_s11 = sand.u32 1, %s1234_s13  }
 0x471   : > { %p1621_p9 = scmp.ne.s32.totalorder %s1613_s28, 0  ;;  %s881_s17 = scalar_lea.sflag [#allocation4], %s880_s11 }
 0x473   : > { %p1041_p11 = pnand %p1046_p7, %p1621_p9 }
 0x475   : > { %1229 = dma.done.wait (!%p1041_p11), %s881_s17, 64  }
 0x476   : > { %1231 = vsyncadd (!%p1041_p11), %s881_s17, 4294967232  ;;  %s24_s20 = sadd.s32 1, %s1262_s20   ;;  %s1622_s27 = sld [smem:[#allocation12_spill]] }
 0x477   : > { %p21_p13 = scmp.ge.s32.totalorder %s24_s20, 6   ;;  %s1623_s16 = sld [smem:[#allocation8_spill]] }
 0x478   : > { %s1624_s17 = sld [smem:[#allocation9_spill]]  ;;  %s1625_s18 = sld [smem:[#allocation10_spill]] }
 0x479   : > { %s1626_s19 = sld [smem:[#allocation11_spill]]  ;;  %s1627_s13 = smov %s1238_s14 }
 0x47a   : > { %s1628_s14 = smov %s1242_s15  ;;  %23 = sbr.rel (!%p21_p13) target bundleno = 6 (0x6), region = 107 }
 0x47c   : > { %s1629_s15 = smov %s1622_s27 }
 0x481   :  { %886 = vsyncpa [#allocation3], 1 }
 0x482   :  { %888 = vsyncpa [#allocation3 + $0x1], 1 }
 0x483   :  { %889 = vsyncpa [#allocation4], 1 }
 0x484   :  { %891 = vsyncpa [#allocation4 + $0x1], 1 }

</bundles_post_ra>
